<compile_context>
chip_gen: v7x
topology: tpu7x:2x2x1
jax: 0.10.0
libtpu: 0.0.40
codegen_flags: <defaults>
</compile_context>

<pallas_src>
import jax
import jax.numpy as jnp
from jax.experimental import pallas as pl
from jax.experimental.pallas import tpu as pltpu

_LANES = 128
_TARGET_TILE_BYTES = 2 * 1024 * 1024  # ~2 MiB per input tile


def _round_up(x: int, m: int) -> int:
    return ((x + m - 1) // m) * m


def _make_kernel(logit_bias):
    # Bias is a Python scalar closed over at trace time -> compile-time const.
    def kernel(x_ref, o_ref):
        o_ref[...] = x_ref[...] + logit_bias

    return kernel


def _run_slab(x2d: jax.Array, logit_bias: float) -> jax.Array:
    rows, lanes = x2d.shape
    itemsize = jnp.dtype(x2d.dtype).itemsize
    # Sublane multiple respecting sub-32-bit packing (8 f32, 16 bf16, 32 int8).
    packing = max(1, 4 // itemsize)
    sublane_mult = 8 * packing

    # ~2 MiB tile, but never bigger than the (sublane-rounded) slab itself.
    tile_rows = max(sublane_mult, _TARGET_TILE_BYTES // (lanes * itemsize))
    tile_rows = min(tile_rows, _round_up(rows, sublane_mult))
    tile_rows = _round_up(tile_rows, sublane_mult)

    grid = (pl.cdiv(rows, tile_rows),)

    return pl.pallas_call(
        _make_kernel(logit_bias),
        out_shape=jax.ShapeDtypeStruct((rows, lanes), x2d.dtype),
        grid_spec=pl.GridSpec(
            grid=grid,
            in_specs=[pl.BlockSpec((tile_rows, lanes), lambda i: (i, 0))],
            out_specs=pl.BlockSpec((tile_rows, lanes), lambda i: (i, 0)),
        ),
        compiler_params=pltpu.CompilerParams(
            dimension_semantics=("parallel",),
        ),
    )(x2d)


def logit_bias_forward(x: jax.Array, logit_bias: float) -> jax.Array:
    """Elementwise `x + logit_bias` via a Pallas TPU kernel. Any input shape."""
    orig_shape = x.shape
    n = x.size
    if n == 0:
        return x

    if n % _LANES == 0:
        # Common case: contiguous reshape to a lane-dense slab, zero copies.
        rows = n // _LANES
        out2d = _run_slab(x.reshape(rows, _LANES), logit_bias)
        return out2d.reshape(orig_shape)

    # Rare unaligned case: pad the flat tail up to a full 128-lane row.
    # (Elementwise op, so the garbage lanes are simply sliced away.)
    rows = pl.cdiv(n, _LANES)
    pad = rows * _LANES - n
    x_flat = jnp.pad(x.reshape(-1), (0, pad))
    out2d = _run_slab(x_flat.reshape(rows, _LANES), logit_bias)
    return out2d.reshape(-1)[:n].reshape(orig_shape)


class LogitBias:
    """JAX/Pallas equivalent of bcos.modules.logitbias.LogitBias."""

    def __init__(self, logit_bias):
        self.logit_bias = logit_bias

    def __call__(self, in_tensor: jax.Array) -> jax.Array:
        return logit_bias_forward(in_tensor, self.logit_bias)

    def extra_repr(self) -> str:
        return f"logit_bias={self.logit_bias}"


if __name__ == "__main__":
    key = jax.random.PRNGKey(0)
    # NCHW input: batch=2, channels=4, spatial=16x16.
    x = jax.random.normal(key, (2, 4, 16, 16), dtype=jnp.float32)

    # Typical bcos usage: logit_bias = -log(num_classes - 1); use 4 classes.
    logit_bias = float(-jnp.log(jnp.array(4.0 - 1.0)))

    module = LogitBias(logit_bias)
    out = jax.block_until_ready(module(x))

    ref = x + logit_bias
    assert out.shape == x.shape and out.dtype == x.dtype
    assert jnp.allclose(out, ref, atol=1e-6, rtol=1e-6)

    print("KERNEL_OK")
</pallas_src>

<mosaic_0001>
module attributes {stable_mosaic.version = 11 : i64} {
  func.func @kernel(%arg0: i32, %arg1: memref<16x128xf32, #tpu.memory_space<vmem>>, %arg2: memref<16x128xf32, #tpu.memory_space<vmem>>) attributes {dimension_semantics = [#tpu.dimension_semantics<parallel>], iteration_bounds = array<i64: 1>, scalar_prefetch = 0 : i64, scratch_operands = 0 : i64, tpu.core_type = #tpu.core_type<tc>, window_params = [{transform_indices = @transform_0, window_bounds = array<i64: 16, 128>}, {transform_indices = @transform_1, window_bounds = array<i64: 16, 128>}]} {
    %c0 = arith.constant 0 : index
    %c0_0 = arith.constant 0 : index
    %0 = vector.load %arg1[%c0, %c0_0] : memref<16x128xf32, #tpu.memory_space<vmem>>, vector<16x128xf32>
    %cst = arith.constant -1.09861231 : f32
    %1 = vector.broadcast %cst : f32 to vector<16x128xf32>
    %2 = arith.addf %0, %1 : vector<16x128xf32>
    %c0_1 = arith.constant 0 : index
    %c0_2 = arith.constant 0 : index
    %3 = vector.load %arg2[%c0_1, %c0_2] : memref<16x128xf32, #tpu.memory_space<vmem>>, vector<16x128xf32>
    tpu.vector_store %arg2[%c0_1, %c0_2], %2 {strides = array<i32>} : memref<16x128xf32, #tpu.memory_space<vmem>>, vector<16x128xf32>,
    return
  }
  func.func @transform_0(%arg0: i32) -> (i32, i32) {
    %c0_i32 = arith.constant 0 : i32
    %c0_i32_0 = arith.constant 0 : i32
    return %arg0, %c0_i32 : i32, i32
  }
  func.func @transform_1(%arg0: i32) -> (i32, i32) {
    %c0_i32 = arith.constant 0 : i32
    %c0_i32_0 = arith.constant 0 : i32
    return %arg0, %c0_i32 : i32, i32
  }
}

</mosaic_0001>

<bundles_post_ra>
// kernel: tpu_custom_call.1
= control target key start
LH: loop header
LB: loop body
LE: loop exit
PB: predicated region body
PF: predicated region fallthrough
CT: control target
= control target key end

     0   :  { %6 = vsyncpa [#allocation3], 0  ;;  %s136_s0 = inlined_call_operand.hbm [shape: f32[16,128], index: 0, kind: input, shape index: {}]   ;;  %s137_s1 = inlined_call_operand.hbm [shape: f32[16,128], index: 1, kind: output, shape index: {}]  }
   0x1   :  { %7 = vsyncpa [#allocation4], 0  ;;  %s98_s6 = smov [#allocation2]   ;;  %s50_s10 = scalar_lea.hbm %s136_s0, 256 }
   0x2   :  { %s13_s7 = sshll.u32 %s98_s6, 4  ;;  %p51_p0 = scmp.ne.s32.totalorder %s136_s0, %s50_s10  ;;  %s14_s7 = int_to_ptr.vmem [resolvable:$true] %s13_s7 }
   0x3   :  { %p54_p1 = scmp.lt.u32.totalorder %s50_s10, %s136_s0 }
   0x5   :  { %p56_p2 = pnand %p54_p1, %p51_p0 }
   0x7   :  { %59 = shalt.err (!%p56_p2)
}
   0x8   :  { %s60_s15 = scalar_lea.vmem %s14_s7, 256  ;;  %p65_p4 = scmp.lt.s32.totalorder %s14_s7, %s14_s7 }
   0x9   :  { %p61_p3 = scmp.ne.s32.totalorder %s14_s7, %s60_s15  ;;  %p66_p5 = scmp.lt.s32.totalorder %s60_s15, %s60_s15 }
   0xb   :  { %p67_p6 = por %p66_p5, %p65_p4 }
   0xd   :  { %p68_p7 = pnand %p67_p6, %p61_p3 }
   0xf   :  { %71 = shalt.err (!%p68_p7)
}
  0x10   :  { %s99_s16 = smov 128   ;;  %s100_s17 = smov 8  }
  0x11   :  { %19 = dma.hbm_to_vmem [thread:$0]  %s136_s0, 256, %s14_s7, [#allocation3], %s99_s16, %s99_s16, %s100_s17  }
  0x12   :  { %94 = dma.done.wait [#allocation3], 256  }
  0x13   :  { %95 = vsyncadd [#allocation3], 4294967040  ;;  %s101_s20 = smov [#allocation5]   ;;  %v23_v0 = vld [vmem:[#allocation2] sm:$0xff]  ;;  %v24_v1 = vld [vmem:[#allocation2 + $0x8] sm:$0xff] }
  0x14   :  { %s34_s21 = sshll.u32 %s101_s20, 4  ;;  %v25_v2 = vadd.f32 -1.0986123, %v23_v0  ;;  %v26_v3 = vadd.f32 -1.0986123, %v24_v1  ;;  %s35_s21 = int_to_ptr.vmem [resolvable:$true] %s34_s21 }
  0x15   :  { %s72_s22 = scalar_lea.vmem %s35_s21, 256  ;;  %p77_p9 = scmp.lt.s32.totalorder %s35_s21, %s35_s21 }
  0x16   :  { %27 = vst [vmem:[#allocation5] sm:$0xff] %v25_v2  ;;  %28 = vst [vmem:[#allocation5 + $0x8] sm:$0xff] %v26_v3  ;;  %p73_p8 = scmp.ne.s32.totalorder %s35_s21, %s72_s22  ;;  %p78_p10 = scmp.lt.s32.totalorder %s72_s22, %s72_s22 }
  0x18   :  { %p79_p11 = por %p78_p10, %p77_p9 }
  0x1a   :  { %p80_p12 = pnand %p79_p11, %p73_p8 }
  0x1c   :  { %83 = shalt.err (!%p80_p12)
}
  0x1d   :  { %s84_s24 = scalar_lea.hbm %s137_s1, 256 }
  0x1e   :  { %p85_p13 = scmp.ne.s32.totalorder %s137_s1, %s84_s24  ;;  %p88_p0 = scmp.lt.u32.totalorder %s84_s24, %s137_s1 }
  0x20   :  { %p90_p1 = pnand %p88_p0, %p85_p13 }
  0x22   :  { %93 = shalt.err (!%p90_p1)
}
  0x23   :  { %40 = dma.vmem_to_hbm [thread:$0]  %s35_s21, 256, %s137_s1, [#allocation4], %s99_s16, %s99_s16, %s100_s17  }
  0x24   :  { %96 = dma.done.wait [#allocation4], 256  }
  0x25   :  { %97 = vsyncadd [#allocation4], 4294967040 }
  0x26   :  { %44 = vsyncpa [#allocation3], 1 }
  0x27   :  { %45 = vsyncpa [#allocation4], 1 }

</bundles_post_ra>
